<compile_context>
chip_gen: v6e
topology: v6e:2x2x1
jax: 0.10.0
libtpu: 0.0.40
codegen_flags: <defaults>
</compile_context>

<pallas_src>
import functools

import jax
import jax.numpy as jnp
from jax.experimental import pallas as pl
from jax.experimental.pallas import tpu as pltpu

IN_DIM = 100
IN_PAD = 128          # fc1 contraction dim padded to a full 128-lane tile
HID_DIM = 256
OUT_DIM = 784         # 28 * 28
OUT_PAD = 896         # 7 * 128 -> lane-dense, unmasked output stores


def generator_kernel(x_ref, w1_ref, b1_ref, w2_ref, b2_ref, o_ref):
    # fc1 + ReLU: bf16 operands, f32 accumulation on the MXU; bias/ReLU in f32.
    h = jnp.dot(x_ref[...].astype(jnp.bfloat16), w1_ref[...],
                preferred_element_type=jnp.float32)
    h = jnp.maximum(h + b1_ref[...], 0.0)
    # fc2 + tanh (tanh runs on the EUP, f32).
    y = jnp.dot(h.astype(jnp.bfloat16), w2_ref[...],
                preferred_element_type=jnp.float32)
    o_ref[...] = jnp.tanh(y + b2_ref[...])


def _round_up(n, m):
    return ((n + m - 1) // m) * m


@functools.partial(jax.jit, static_argnames=("tm",))
def simple_generator(x, w1, b1, w2, b2, *, tm=512):
    """x: (B, 100) f32. w1/w2 bf16 padded, b1/b2 f32 padded (see prepare_params).
    Returns (B, 1, 28, 28) f32, matching the PyTorch module."""
    B = x.shape[0]
    # Zero-pad the fc1 contraction dim 100 -> 128 (numerically free).
    x_pad = jnp.pad(x.astype(jnp.float32), ((0, 0), (0, IN_PAD - IN_DIM)))

    # Batch tile: multiple of 8 sublanes, capped at 512 rows per grid step.
    tm = min(tm, _round_up(B, 8))
    grid = (pl.cdiv(B, tm),)

    flops = 2 * B * (IN_PAD * HID_DIM + HID_DIM * OUT_PAD)
    bytes_accessed = (B * IN_PAD * 4 + B * OUT_PAD * 4                 # x, out (f32)
                      + (IN_PAD * HID_DIM + HID_DIM * OUT_PAD) * 2     # weights (bf16)
                      + (HID_DIM + OUT_PAD) * 4)                       # biases (f32)

    out = pl.pallas_call(
        generator_kernel,
        out_shape=jax.ShapeDtypeStruct((B, OUT_PAD), jnp.float32),
        grid=grid,
        in_specs=[
            pl.BlockSpec((tm, IN_PAD), lambda i: (i, 0)),        # x: tiled over batch
            pl.BlockSpec((IN_PAD, HID_DIM), lambda i: (0, 0)),   # weights/biases stay
            pl.BlockSpec((1, HID_DIM), lambda i: (0, 0)),        # VMEM-resident across
            pl.BlockSpec((HID_DIM, OUT_PAD), lambda i: (0, 0)),  # all batch tiles
            pl.BlockSpec((1, OUT_PAD), lambda i: (0, 0)),
        ],
        out_specs=pl.BlockSpec((tm, OUT_PAD), lambda i: (i, 0)),
        compiler_params=pltpu.CompilerParams(
            # Batch tiles are independent -> lets v7x shard them across its 2 TCs.
            dimension_semantics=("parallel",),
        ),
        cost_estimate=pl.CostEstimate(
            flops=flops,
            transcendentals=B * OUT_PAD,
            bytes_accessed=bytes_accessed,
        ),
    )(x_pad, w1, b1, w2, b2)

    # TODO(synk): if the downstream consumer accepts (B, 784), return the
    # lane-dense slab directly and skip this slice + NCHW view (saves a relayout).
    return out[:, :OUT_DIM].reshape(B, 1, 28, 28)


def init_params(key):
    """Deterministic init mimicking nn.Linear default (uniform +/- 1/sqrt(fan_in)).
    Stored as (in, out) so the kernel computes x @ W (PyTorch does x @ W.T)."""
    k1, k2, k3, k4 = jax.random.split(key, 4)
    lim1 = 1.0 / jnp.sqrt(IN_DIM)
    lim2 = 1.0 / jnp.sqrt(HID_DIM)
    w1 = jax.random.uniform(k1, (IN_DIM, HID_DIM), jnp.float32, -lim1, lim1)
    b1 = jax.random.uniform(k2, (HID_DIM,), jnp.float32, -lim1, lim1)
    w2 = jax.random.uniform(k3, (HID_DIM, OUT_DIM), jnp.float32, -lim2, lim2)
    b2 = jax.random.uniform(k4, (OUT_DIM,), jnp.float32, -lim2, lim2)
    return w1, b1, w2, b2


def prepare_params(w1, b1, w2, b2):
    """Pad K: 100->128 and N: 784->896 with zeros, cast weights to bf16 so the
    kernel sees lane/sublane-aligned, MXU-native operands. Biases stay f32."""
    w1p = jnp.pad(w1, ((0, IN_PAD - IN_DIM), (0, 0))).astype(jnp.bfloat16)
    b1p = b1.reshape(1, HID_DIM).astype(jnp.float32)
    w2p = jnp.pad(w2, ((0, 0), (0, OUT_PAD - OUT_DIM))).astype(jnp.bfloat16)
    b2p = jnp.pad(b2, (0, OUT_PAD - OUT_DIM)).reshape(1, OUT_PAD).astype(jnp.float32)
    return w1p, b1p, w2p, b2p


if __name__ == "__main__":
    key = jax.random.PRNGKey(0)
    kx, kp = jax.random.split(key)

    B = 8  # small example batch (real speedups need B >= 256; see review)
    x = jax.random.normal(kx, (B, IN_DIM), jnp.float32)
    w1, b1, w2, b2 = init_params(kp)
    kw1, kb1, kw2, kb2 = prepare_params(w1, b1, w2, b2)

    out = simple_generator(x, kw1, kb1, kw2, kb2)
    out = jax.block_until_ready(out)

    # Plain-JAX f32 reference of the same math. Kernel uses bf16 MXU operands
    # with f32 accumulation, so tolerance is deliberately loosened.
    ref = jnp.tanh(jnp.maximum(x @ w1 + b1, 0.0) @ w2 + b2).reshape(B, 1, 28, 28)
    assert out.shape == (B, 1, 28, 28), out.shape
    err = float(jnp.max(jnp.abs(out - ref)))
    assert jnp.allclose(out, ref, atol=2e-2, rtol=0.0), err

    print("KERNEL_OK")
</pallas_src>

<mosaic_0001>
module attributes {stable_mosaic.version = 11 : i64} {
  func.func @generator_kernel(%arg0: i32, %arg1: memref<8x128xf32, #tpu.memory_space<vmem>>, %arg2: memref<128x256xbf16, #tpu.memory_space<vmem>>, %arg3: memref<1x256xf32, #tpu.memory_space<vmem>>, %arg4: memref<256x896xbf16, #tpu.memory_space<vmem>>, %arg5: memref<1x896xf32, #tpu.memory_space<vmem>>, %arg6: memref<8x896xf32, #tpu.memory_space<vmem>>) attributes {dimension_semantics = [#tpu.dimension_semantics<parallel>], iteration_bounds = array<i64: 1>, scalar_prefetch = 0 : i64, scratch_operands = 0 : i64, tpu.core_type = #tpu.core_type<tc>, window_params = [{transform_indices = @transform_0, window_bounds = array<i64: 8, 128>}, {pipeline_mode = #tpu.pipeline_mode<synchronous>, transform_indices = @transform_1, window_bounds = array<i64: 128, 256>}, {pipeline_mode = #tpu.pipeline_mode<synchronous>, transform_indices = @transform_2, window_bounds = array<i64: 1, 256>}, {pipeline_mode = #tpu.pipeline_mode<synchronous>, transform_indices = @transform_3, window_bounds = array<i64: 256, 896>}, {pipeline_mode = #tpu.pipeline_mode<synchronous>, transform_indices = @transform_4, window_bounds = array<i64: 1, 896>}, {transform_indices = @transform_5, window_bounds = array<i64: 8, 896>}]} {
    %c0 = arith.constant 0 : index
    %c0_0 = arith.constant 0 : index
    %0 = vector.load %arg1[%c0, %c0_0] : memref<8x128xf32, #tpu.memory_space<vmem>>, vector<8x128xf32>
    %1 = arith.truncf %0 : vector<8x128xf32> to vector<8x128xbf16>
    %c0_1 = arith.constant 0 : index
    %c0_2 = arith.constant 0 : index
    %2 = vector.load %arg2[%c0_1, %c0_2] : memref<128x256xbf16, #tpu.memory_space<vmem>>, vector<128x256xbf16>
    %cst = arith.constant dense<0.000000e+00> : vector<8x256xf32>
    %3 = tpu.matmul %1, %2, %cst {dimension_numbers = #tpu.dot_dimension_numbers<[1], [0], [0], [1], [0, 0, 1, 1], [], []>} : vector<8x128xbf16>, vector<128x256xbf16>, vector<8x256xf32> -> vector<8x256xf32>
    %c0_3 = arith.constant 0 : index
    %c0_4 = arith.constant 0 : index
    %4 = vector.load %arg3[%c0_3, %c0_4] : memref<1x256xf32, #tpu.memory_space<vmem>>, vector<1x256xf32>
    %5 = vector.broadcast %4 : vector<1x256xf32> to vector<8x256xf32>
    %6 = arith.addf %3, %5 : vector<8x256xf32>
    %cst_5 = arith.constant 0.000000e+00 : f32
    %7 = vector.broadcast %cst_5 : f32 to vector<8x256xf32>
    %8 = arith.maximumf %6, %7 : vector<8x256xf32>
    %9 = arith.truncf %8 : vector<8x256xf32> to vector<8x256xbf16>
    %c0_6 = arith.constant 0 : index
    %c0_7 = arith.constant 0 : index
    %10 = vector.load %arg4[%c0_6, %c0_7] : memref<256x896xbf16, #tpu.memory_space<vmem>>, vector<256x896xbf16>
    %cst_8 = arith.constant dense<0.000000e+00> : vector<8x896xf32>
    %11 = tpu.matmul %9, %10, %cst_8 {dimension_numbers = #tpu.dot_dimension_numbers<[1], [0], [0], [1], [0, 0, 1, 1], [], []>} : vector<8x256xbf16>, vector<256x896xbf16>, vector<8x896xf32> -> vector<8x896xf32>
    %c0_9 = arith.constant 0 : index
    %c0_10 = arith.constant 0 : index
    %12 = vector.load %arg5[%c0_9, %c0_10] : memref<1x896xf32, #tpu.memory_space<vmem>>, vector<1x896xf32>
    %13 = vector.broadcast %12 : vector<1x896xf32> to vector<8x896xf32>
    %14 = arith.addf %11, %13 : vector<8x896xf32>
    %15 = math.tanh %14 : vector<8x896xf32>
    %c0_11 = arith.constant 0 : index
    %c0_12 = arith.constant 0 : index
    %16 = vector.load %arg6[%c0_11, %c0_12] : memref<8x896xf32, #tpu.memory_space<vmem>>, vector<8x896xf32>
    tpu.vector_store %arg6[%c0_11, %c0_12], %15 {strides = array<i32>} : memref<8x896xf32, #tpu.memory_space<vmem>>, vector<8x896xf32>,
    return
  }
  func.func @transform_0(%arg0: i32) -> (i32, i32) {
    %c0_i32 = arith.constant 0 : i32
    %c0_i32_0 = arith.constant 0 : i32
    return %arg0, %c0_i32 : i32, i32
  }
  func.func @transform_1(%arg0: i32) -> (i32, i32) {
    %c0_i32 = arith.constant 0 : i32
    %c0_i32_0 = arith.constant 0 : i32
    %c0_i32_1 = arith.constant 0 : i32
    return %c0_i32, %c0_i32_0 : i32, i32
  }
  func.func @transform_2(%arg0: i32) -> (i32, i32) {
    %c0_i32 = arith.constant 0 : i32
    %c0_i32_0 = arith.constant 0 : i32
    %c0_i32_1 = arith.constant 0 : i32
    return %c0_i32, %c0_i32_0 : i32, i32
  }
  func.func @transform_3(%arg0: i32) -> (i32, i32) {
    %c0_i32 = arith.constant 0 : i32
    %c0_i32_0 = arith.constant 0 : i32
    %c0_i32_1 = arith.constant 0 : i32
    return %c0_i32, %c0_i32_0 : i32, i32
  }
  func.func @transform_4(%arg0: i32) -> (i32, i32) {
    %c0_i32 = arith.constant 0 : i32
    %c0_i32_0 = arith.constant 0 : i32
    %c0_i32_1 = arith.constant 0 : i32
    return %c0_i32, %c0_i32_0 : i32, i32
  }
  func.func @transform_5(%arg0: i32) -> (i32, i32) {
    %c0_i32 = arith.constant 0 : i32
    %c0_i32_0 = arith.constant 0 : i32
    return %arg0, %c0_i32 : i32, i32
  }
}

</mosaic_0001>

<bundles_post_ra>
// kernel: simple_generator.1
= control target key start
LH: loop header
LB: loop body
LE: loop exit
PB: predicated region body
PF: predicated region fallthrough
CT: control target
= control target key end

     0   :  { %10 = vsyncpa [#allocation3], 0  ;;  %s1623_s0 = inlined_call_operand.vmem [shape: f32[8,128], index: 0, kind: input, shape index: {}]   ;;  %s1624_s1 = inlined_call_operand.hbm [shape: bf16[128,256], index: 1, kind: input, shape index: {}]   ;;  %s1625_s2 = inlined_call_operand.vmem [shape: f32[1,256], index: 2, kind: input, shape index: {}]   ;;  %s1626_s3 = inlined_call_operand.hbm [shape: bf16[256,896], index: 3, kind: input, shape index: {}]   ;;  %s1627_s4 = inlined_call_operand.vmem [shape: f32[1,896], index: 4, kind: input, shape index: {}]   ;;  %s1628_s5 = inlined_call_operand.vmem [shape: f32[8,896], index: 5, kind: output, shape index: {}]  }
   0x1   :  { %11 = vsyncpa [#allocation5], 0  ;;  %s1527_s18 = smov [#allocation2]  }
   0x2   :  { %s19_s19 = sshll.u32 %s1527_s18, 4  ;;  %s20_s19 = int_to_ptr.vmem [resolvable:$true] %s19_s19 }
   0x3   :  { %s1491_s20 = scalar_lea.vmem %s20_s19, 2048  ;;  %p1496_p1 = scmp.lt.s32.totalorder %s20_s19, %s20_s19 }
   0x4   :  { %p1492_p0 = scmp.ne.s32.totalorder %s20_s19, %s1491_s20  ;;  %p1497_p2 = scmp.lt.s32.totalorder %s1491_s20, %s1491_s20 }
   0x6   :  { %p1498_p3 = por %p1497_p2, %p1496_p1 }
   0x8   :  { %p1499_p4 = pnand %p1498_p3, %p1492_p0 }
   0xa   :  { %1502 = shalt.err (!%p1499_p4)
}
   0xb   :  { %s1528_s21 = smov 128   ;;  %s1529_s22 = smov 8  }
   0xc   :  { %25 = dma.hbm_to_vmem [thread:$0]  %s1624_s1, 2048, %s20_s19, [#allocation3], %s1528_s21, %s1528_s21, %s1529_s22  }
   0xd   :  { %s1530_s25 = smov [#allocation4]  }
   0xe   :  { %s33_s26 = sshll.u32 %s1530_s25, 4  ;;  %s34_s26 = int_to_ptr.vmem [resolvable:$true] %s33_s26 }
   0xf   :  { %s1511_s27 = scalar_lea.vmem %s34_s26, 14336  ;;  %p1516_p6 = scmp.lt.s32.totalorder %s34_s26, %s34_s26 }
  0x10   :  { %p1512_p5 = scmp.ne.s32.totalorder %s34_s26, %s1511_s27  ;;  %p1517_p7 = scmp.lt.s32.totalorder %s1511_s27, %s1511_s27 }
  0x12   :  { %p1518_p8 = por %p1517_p7, %p1516_p6 }
  0x14   :  { %p1519_p9 = pnand %p1518_p8, %p1512_p5 }
  0x16   :  { %1522 = shalt.err (!%p1519_p9)
}
  0x17   :  { %s1531_s28 = smov 448   ;;  %s1532_s29 = smov 28  }
  0x18   :  { %39 = dma.hbm_to_vmem [thread:$0]  %s1626_s3, 14336, %s34_s26, [#allocation5], %s1531_s28, %s1531_s28, %s1532_s29  }
  0x19   :  { %1523 = dma.done.wait [#allocation3], 2048  }
  0x1a   :  { %1524 = vsyncadd [#allocation3], 4294965248 }
  0x1b   :  { %1525 = dma.done.wait [#allocation5], 14336  }
  0x1c   :  { %1526 = vsyncadd [#allocation5], 4294952960  ;;  %v1533_v0 = vmov 0   ;;  %v1285_v1 = vld [vmem:[#allocation2 + $0x74] ss:$8 sps:$4 sm:$0xff]   ;;  %v49_v26 = vld [vmem:[%s1623_s0] sm:$0xff] }
  0x1d   :  { %191 = vmatprep.mubr.bf16.mxu0 %v1533_v0  ;;  %v1287_v2 = vld [vmem:[#allocation2 + $0x70] ss:$8 sps:$4 sm:$0xff]   ;;  %159 = vmatprep.subr.bf16.mxu0 %v1285_v1  ;;  %v1288_v3 = vld [vmem:[#allocation2 + $0x64] ss:$8 sps:$4 sm:$0xff]   ;;  %v1290_v4 = vld [vmem:[#allocation2 + $0x60] ss:$8 sps:$4 sm:$0xff]   ;;  %v50_v30 = vpack.c.bf16 %v49_v26, %v49_v26 }
  0x1e   :  { %160 = vmatpush1.bf16.msra.mxu0 %v1287_v2  ;;  %v1291_v5 = vld [vmem:[#allocation2 + $0x54] ss:$8 sps:$4 sm:$0xff]   ;;  %v1293_v6 = vld [vmem:[#allocation2 + $0x50] ss:$8 sps:$4 sm:$0xff]   ;;  %v1294_v7 = vld [vmem:[#allocation2 + $0x44] ss:$8 sps:$4 sm:$0xff]  }
  0x1f   :  { %161 = vmatprep.subr.bf16.mxu0 %v1288_v3  ;;  %v1296_v8 = vld [vmem:[#allocation2 + $0x40] ss:$8 sps:$4 sm:$0xff]   ;;  %v1297_v10 = vld [vmem:[#allocation2 + $0x34] ss:$8 sps:$4 sm:$0xff]   ;;  %v1299_v13 = vld [vmem:[#allocation2 + $0x30] ss:$8 sps:$4 sm:$0xff]  }
  0x20   :  { %v1309_v9 = vld [vmem:[#allocation4 + $0x18c] ss:$28 sps:$4 sm:$0xff]   ;;  %v1315_v12 = vld [vmem:[#allocation4 + $0x154] ss:$28 sps:$4 sm:$0xff]   ;;  %v1321_v16 = vld [vmem:[#allocation4 + $0x11c] ss:$28 sps:$4 sm:$0xff]  }
  0x21   :  { %945 = vmatprep.subr.bf16.mxu1 %v1309_v9  ;;  %v1314_v11 = vld [vmem:[#allocation4 + $0x188] ss:$28 sps:$4 sm:$0xff]   ;;  %v1320_v15 = vld [vmem:[#allocation4 + $0x150] ss:$28 sps:$4 sm:$0xff]   ;;  %v1303_v18 = vld [vmem:[#allocation2 + $0x14] ss:$8 sps:$4 sm:$0xff]  }
  0x22   :  { %162 = vmatpush1.bf16.msra.mxu0 %v1290_v4  ;;  %v1300_v14 = vld [vmem:[#allocation2 + $0x24] ss:$8 sps:$4 sm:$0xff]   ;;  %946 = vmatpush1.bf16.msra.mxu1 %v1314_v11  ;;  %v1302_v17 = vld [vmem:[#allocation2 + $0x20] ss:$8 sps:$4 sm:$0xff]   ;;  %v1326_v19 = vld [vmem:[#allocation4 + $0x118] ss:$28 sps:$4 sm:$0xff]  }
  0x23   :  { %163 = vmatprep.subr.bf16.mxu0 %v1291_v5  ;;  %947 = vmatprep.subr.bf16.mxu1 %v1315_v12  ;;  %v1327_v20 = vld [vmem:[#allocation4 + $0xe4] ss:$28 sps:$4 sm:$0xff]   ;;  %v1305_v21 = vld [vmem:[#allocation2 + $0x10] ss:$8 sps:$4 sm:$0xff]   ;;  %v1333_v24 = vld [vmem:[#allocation4 + $0xac] ss:$28 sps:$4 sm:$0xff]  }
  0x24   :  { %v1306_v22 = vld [vmem:[#allocation2 + $0x4] ss:$8 sps:$4 sm:$0xff]   ;;  %v1332_v23 = vld [vmem:[#allocation4 + $0xe0] ss:$28 sps:$4 sm:$0xff]   ;;  %v1313_v27 = vld [vmem:[#allocation4 + $0x194] ss:$28 sps:$4 sm:$0xff]  }
  0x25   :  { %v1308_v25 = vld [vmem:[#allocation2] ss:$8 sps:$4 sm:$0xff]   ;;  %v1339_v29 = vld [vmem:[#allocation4 + $0x74] ss:$28 sps:$4 sm:$0xff]   ;;  %v1319_v32 = vld [vmem:[#allocation4 + $0x15c] ss:$28 sps:$4 sm:$0xff]  }
  0x26   :  { %164 = vmatpush1.bf16.msra.mxu0 %v1293_v6  ;;  %948 = vmatpush1.bf16.msra.mxu1 %v1320_v15  ;;  %v1338_v28 = vld [vmem:[#allocation4 + $0xa8] ss:$28 sps:$4 sm:$0xff]   ;;  %v1311_v31 = vld [vmem:[#allocation4 + $0x190] ss:$28 sps:$4 sm:$0xff]   ;;  %v1345_v34 = vld [vmem:[#allocation4 + $0x3c] ss:$28 sps:$4 sm:$0xff]  }
  0x27   :  { %165 = vmatprep.subr.bf16.mxu0 %v1294_v7  ;;  %949 = vmatprep.subr.bf16.mxu1 %v1321_v16  ;;  %v1344_v33 = vld [vmem:[#allocation4 + $0x70] ss:$28 sps:$4 sm:$0xff]   ;;  %v1317_v35 = vld [vmem:[#allocation4 + $0x158] ss:$28 sps:$4 sm:$0xff]   ;;  %v1325_v36 = vld [vmem:[#allocation4 + $0x124] ss:$28 sps:$4 sm:$0xff]  }
  0x28   :  { %v1350_v37 = vld [vmem:[#allocation4 + $0x38] ss:$28 sps:$4 sm:$0xff]   ;;  %v1351_v38 = vld [vmem:[#allocation4 + $0x4] ss:$28 sps:$4 sm:$0xff]   ;;  %v1331_v40 = vld [vmem:[#allocation4 + $0xec] ss:$28 sps:$4 sm:$0xff]  }
  0x29   :  { %v1323_v39 = vld [vmem:[#allocation4 + $0x120] ss:$28 sps:$4 sm:$0xff]   ;;  %v1357_v42 = vld [vmem:[#allocation4 + $0x34c] ss:$28 sps:$4 sm:$0xff]   ;;  %v1337_v44 = vld [vmem:[#allocation4 + $0xb4] ss:$28 sps:$4 sm:$0xff]  }
  0x2a   :  { %166 = vmatpush1.bf16.msra.mxu0 %v1296_v8  ;;  %950 = vmatpush1.bf16.msra.mxu1 %v1326_v19  ;;  %v1356_v41 = vld [vmem:[#allocation4] ss:$28 sps:$4 sm:$0xff]   ;;  %v1329_v43 = vld [vmem:[#allocation4 + $0xe8] ss:$28 sps:$4 sm:$0xff]   ;;  %v1363_v46 = vld [vmem:[#allocation4 + $0x314] ss:$28 sps:$4 sm:$0xff]  }
  0x2b   :  { %167 = vmatprep.subr.bf16.mxu0 %v1297_v10  ;;  %951 = vmatprep.subr.bf16.mxu1 %v1327_v20  ;;  %v1362_v45 = vld [vmem:[#allocation4 + $0x348] ss:$28 sps:$4 sm:$0xff]   ;;  %v1335_v47 = vld [vmem:[#allocation4 + $0xb0] ss:$28 sps:$4 sm:$0xff]   ;;  %v1343_v49 = vld [vmem:[#allocation4 + $0x7c] ss:$28 sps:$4 sm:$0xff]  }
  0x2c   :  { %v1368_v48 = vld [vmem:[#allocation4 + $0x310] ss:$28 sps:$4 sm:$0xff]   ;;  %v1369_v50 = vld [vmem:[#allocation4 + $0x2dc] ss:$28 sps:$4 sm:$0xff]   ;;  %v1349_v53 = vld [vmem:[#allocation4 + $0x44] ss:$28 sps:$4 sm:$0xff]  }
  0x2d   :  { %v1341_v51 = vld [vmem:[#allocation4 + $0x78] ss:$28 sps:$4 sm:$0xff]   ;;  %v1375_v54 = vld [vmem:[#allocation4 + $0x2a4] ss:$28 sps:$4 sm:$0xff]   ;;  %v1355_v57 = vld [vmem:[#allocation4 + $0xc] ss:$28 sps:$4 sm:$0xff]  }
  0x2e   :  { %168 = vmatpush1.bf16.msra.mxu0 %v1299_v13  ;;  %952 = vmatpush1.bf16.msra.mxu1 %v1332_v23  ;;  %v1374_v52 = vld [vmem:[#allocation4 + $0x2d8] ss:$28 sps:$4 sm:$0xff]   ;;  %v1347_v55 = vld [vmem:[#allocation4 + $0x40] ss:$28 sps:$4 sm:$0xff]   ;;  %v1381_v58 = vld [vmem:[#allocation4 + $0x26c] ss:$28 sps:$4 sm:$0xff]  }
  0x2f   :  { %169 = vmatprep.subr.bf16.mxu0 %v1300_v14  ;;  %953 = vmatprep.subr.bf16.mxu1 %v1333_v24  ;;  %v1380_v56 = vld [vmem:[#allocation4 + $0x2a0] ss:$28 sps:$4 sm:$0xff]   ;;  %v1353_v59 = vld [vmem:[#allocation4 + $0x8] ss:$28 sps:$4 sm:$0xff]   ;;  %v1361_v61 = vld [vmem:[#allocation4 + $0x354] ss:$28 sps:$4 sm:$0xff]  }
  0x30   :  { %v1386_v60 = vld [vmem:[#allocation4 + $0x268] ss:$28 sps:$4 sm:$0xff]   ;;  %v1387_v62 = vld [vmem:[#allocation4 + $0x234] ss:$28 sps:$4 sm:$0xff]   ;;  %v1367_v1 = vld [vmem:[#allocation4 + $0x31c] ss:$28 sps:$4 sm:$0xff]  }
  0x31   :  { %v1359_v63 = vld [vmem:[#allocation4 + $0x350] ss:$28 sps:$4 sm:$0xff]   ;;  %v1365_v2 = vld [vmem:[#allocation4 + $0x318] ss:$28 sps:$4 sm:$0xff]   ;;  %v1373_v3 = vld [vmem:[#allocation4 + $0x2e4] ss:$28 sps:$4 sm:$0xff]  }
  0x32   :  { %170 = vmatpush1.bf16.msra.mxu0 %v1302_v17  ;;  %954 = vmatpush1.bf16.msra.mxu1 %v1338_v28  ;;  %v1392_v0 = vld [vmem:[#allocation4 + $0x230] ss:$28 sps:$4 sm:$0xff]   ;;  %v1371_v4 = vld [vmem:[#allocation4 + $0x2e0] ss:$28 sps:$4 sm:$0xff]   ;;  %v1377_v6 = vld [vmem:[#allocation4 + $0x2a8] ss:$28 sps:$4 sm:$0xff]  }
  0x33   :  { %171 = vmatprep.subr.bf16.mxu0 %v1303_v18  ;;  %955 = vmatprep.subr.bf16.mxu1 %v1339_v29  ;;  %v1379_v5 = vld [vmem:[#allocation4 + $0x2ac] ss:$28 sps:$4 sm:$0xff]   ;;  %v1385_v7 = vld [vmem:[#allocation4 + $0x274] ss:$28 sps:$4 sm:$0xff]   ;;  %v1391_v9 = vld [vmem:[#allocation4 + $0x23c] ss:$28 sps:$4 sm:$0xff]  }
  0x34   :  { %v1383_v8 = vld [vmem:[#allocation4 + $0x270] ss:$28 sps:$4 sm:$0xff]   ;;  %v1389_v10 = vld [vmem:[#allocation4 + $0x238] ss:$28 sps:$4 sm:$0xff]   ;;  %v1397_v12 = vld [vmem:[#allocation4 + $0x204] ss:$28 sps:$4 sm:$0xff]  }
  0x35   :  { %v1393_v11 = vld [vmem:[#allocation4 + $0x1fc] ss:$28 sps:$4 sm:$0xff]   ;;  %v1399_v15 = vld [vmem:[#allocation4 + $0x1c4] ss:$28 sps:$4 sm:$0xff]   ;;  %v1403_v16 = vld [vmem:[#allocation4 + $0x1cc] ss:$28 sps:$4 sm:$0xff]  }
  0x36   :  { %172 = vmatpush1.bf16.msra.mxu0 %v1305_v21  ;;  %956 = vmatpush1.bf16.msra.mxu1 %v1344_v33  ;;  %v1395_v13 = vld [vmem:[#allocation4 + $0x200] ss:$28 sps:$4 sm:$0xff]   ;;  %v1398_v14 = vld [vmem:[#allocation4 + $0x1f8] ss:$28 sps:$4 sm:$0xff]   ;;  %v1401_v17 = vld [vmem:[#allocation4 + $0x1c8] ss:$28 sps:$4 sm:$0xff]   ;;  %v69_v21 = vlaneseq }
  0x37   :  { %173 = vmatprep.subr.bf16.mxu0 %v1306_v22  ;;  %957 = vmatprep.subr.bf16.mxu1 %v1345_v34  ;;  %v1404_v18 = vld [vmem:[#allocation4 + $0x1c0] ss:$28 sps:$4 sm:$0xff]  }
  0x38   :  { %v1407_v19 = vld [vmem:[#allocation4 + $0x19c] ss:$28 sps:$4 sm:$0xff]   ;;  %v1573_v22 = vshrl.u32 %v69_v21, 7  ;;  %v67_v24 = vld [vmem:[%s1625_s2] sm:$0x3] }
  0x39   :  { %v1408_v20 = vld [vmem:[#allocation4 + $0x360] ss:$28 sps:$4 sm:$0xff]  }
  0x3a   :  { %174 = vmatpush1.bf16.msra.mxu0 %v1308_v25  ;;  %958 = vmatpush1.bf16.msra.mxu1 %v1350_v37  ;;  %v71_v23 = vsub.s32 0, %v1573_v22  ;;  %v75_v25 = vsub.s32 1, %v1573_v22  ;;  %v1405_v37 = vld [vmem:[#allocation4 + $0x198] ss:$28 sps:$4 sm:$0xff]   ;;  %v332_v21 = vld [vmem:[%s1627_s4] sm:$0xff] }
  0x3b   :  { %986 = vmatprep.subr.bf16.mxu0 %v1313_v27  ;;  %959 = vmatprep.subr.bf16.mxu1 %v1351_v38  ;;  %v1409_v38 = vld [vmem:[#allocation4 + $0x1a0] ss:$28 sps:$4 sm:$0xff]  }
  0x3c   :  { %v72_v26 = vrot.slane %v67_v24, %v71_v23  ;;  %v76_v27 = vrot.slane %v67_v24, %v75_v25  ;;  %v348_v24 = vsub.s32 3, %v1573_v22 }
  0x3d   :  { %192 = vmatmul.mubr.bf16.vlgmr.msra.gmra.mxu0 %v50_v30 }
  0x3e   :  { %987 = vmatpush1.bf16.msra.mxu0 %v1311_v31  ;;  %960 = vmatpush1.bf16.msra.mxu1 %v1356_v41  ;;  %v1413_v41 = vld [vmem:[#allocation4 + $0x328] ss:$28 sps:$4 sm:$0xff]  }
  0x3f   :  { %988 = vmatprep.subr.bf16.mxu0 %v1319_v32  ;;  %961 = vmatprep.subr.bf16.mxu1 %v1357_v42  ;;  %v1410_v42 = vld [vmem:[#allocation4 + $0x160] ss:$28 sps:$4 sm:$0xff]  }
  0x42   :  { %989 = vmatpush1.bf16.msra.mxu0 %v1317_v35  ;;  %962 = vmatpush2.bf16.msra.mxu1 %v1362_v45  ;;  %v1418_v45 = vld [vmem:[#allocation4 + $0x2f0] ss:$28 sps:$4 sm:$0xff]  }
  0x43   :  { %990 = vmatprep.subr.bf16.mxu0 %v1325_v36  ;;  %963 = vmatprep.subr.bf16.mxu1 %v1363_v46  ;;  %v1415_v46 = vld [vmem:[#allocation4 + $0x128] ss:$28 sps:$4 sm:$0xff]  }
  0x46   :  { %991 = vmatpush1.bf16.msra.mxu0 %v1323_v39  ;;  %964 = vmatpush2.bf16.msra.mxu1 %v1368_v48  ;;  %v1422_v48 = vld [vmem:[#allocation4 + $0xf4] ss:$28 sps:$4 sm:$0xff]  }
  0x47   :  { %992 = vmatprep.subr.bf16.mxu0 %v1331_v40  ;;  %965 = vmatprep.subr.bf16.mxu1 %v1369_v50  ;;  %v1412_v40 = vld [vmem:[#allocation4 + $0x164] ss:$28 sps:$4 sm:$0xff]   ;;  %v1420_v50 = vld [vmem:[#allocation4 + $0xf0] ss:$28 sps:$4 sm:$0xff]  }
  0x4a   :  { %993 = vmatpush1.bf16.msra.mxu0 %v1329_v43  ;;  %966 = vmatpush2.bf16.msra.mxu1 %v1374_v52  ;;  %v1414_v43 = vld [vmem:[#allocation4 + $0x168] ss:$28 sps:$4 sm:$0xff]   ;;  %v1427_v52 = vld [vmem:[#allocation4 + $0xbc] ss:$28 sps:$4 sm:$0xff]  }
  0x4b   :  { %994 = vmatprep.subr.bf16.mxu0 %v1337_v44  ;;  %967 = vmatprep.subr.bf16.mxu1 %v1375_v54  ;;  %v1417_v44 = vld [vmem:[#allocation4 + $0x12c] ss:$28 sps:$4 sm:$0xff]   ;;  %v1425_v54 = vld [vmem:[#allocation4 + $0xb8] ss:$28 sps:$4 sm:$0xff]  }
  0x4e   :  { %995 = vmatpush1.bf16.msra.mxu0 %v1335_v47  ;;  %968 = vmatpush2.bf16.msra.mxu1 %v1380_v56  ;;  %v1419_v47 = vld [vmem:[#allocation4 + $0x130] ss:$28 sps:$4 sm:$0xff]   ;;  %v1432_v56 = vld [vmem:[#allocation4 + $0x84] ss:$28 sps:$4 sm:$0xff]  }
  0x4f   :  { %996 = vmatprep.subr.bf16.mxu0 %v1343_v49  ;;  %969 = vmatprep.subr.bf16.mxu1 %v1381_v58  ;;  %v1423_v49 = vld [vmem:[#allocation4 + $0x2b8] ss:$28 sps:$4 sm:$0xff]   ;;  %v1430_v58 = vld [vmem:[#allocation4 + $0x80] ss:$28 sps:$4 sm:$0xff]  }
  0x52   :  { %997 = vmatpush1.bf16.msra.mxu0 %v1341_v51  ;;  %970 = vmatpush2.bf16.msra.mxu1 %v1386_v60  ;;  %v1424_v51 = vld [vmem:[#allocation4 + $0xf8] ss:$28 sps:$4 sm:$0xff]   ;;  %v1437_v60 = vld [vmem:[#allocation4 + $0x4c] ss:$28 sps:$4 sm:$0xff]  }
  0x53   :  { %998 = vmatprep.subr.bf16.mxu0 %v1349_v53  ;;  %971 = vmatprep.subr.bf16.mxu1 %v1387_v62  ;;  %v1428_v53 = vld [vmem:[#allocation4 + $0x280] ss:$28 sps:$4 sm:$0xff]   ;;  %v1435_v62 = vld [vmem:[#allocation4 + $0x48] ss:$28 sps:$4 sm:$0xff]  }
  0x56   :  { %999 = vmatpush1.bf16.msra.mxu0 %v1347_v55  ;;  %972 = vmatpush2.bf16.msra.mxu1 %v1392_v0  ;;  %v1429_v55 = vld [vmem:[#allocation4 + $0xc0] ss:$28 sps:$4 sm:$0xff]   ;;  %v1442_v0 = vld [vmem:[#allocation4 + $0x14] ss:$28 sps:$4 sm:$0xff]  }
  0x57   :  { %1000 = vmatprep.subr.bf16.mxu0 %v1355_v57  ;;  %973 = vmatprep.subr.bf16.mxu1 %v1393_v11  ;;  %v1433_v57 = vld [vmem:[#allocation4 + $0x248] ss:$28 sps:$4 sm:$0xff]   ;;  %v1454_v11 = vld [vmem:[#allocation4 + $0x2b0] ss:$28 sps:$4 sm:$0xff]  }
  0x5a   :  { %1001 = vmatpush1.bf16.msra.mxu0 %v1353_v59  ;;  %974 = vmatpush2.bf16.msra.mxu1 %v1398_v14  ;;  %v1434_v59 = vld [vmem:[#allocation4 + $0x88] ss:$28 sps:$4 sm:$0xff]  }
  0x5b   :  { %1002 = vmatprep.subr.bf16.mxu0 %v1361_v61  ;;  %975 = vmatprep.subr.bf16.mxu1 %v1399_v15  ;;  %v1438_v61 = vld [vmem:[#allocation4 + $0x210] ss:$28 sps:$4 sm:$0xff]   ;;  %v1462_v14 = vld [vmem:[#allocation4 + $0x244] ss:$28 sps:$4 sm:$0xff]  }
  0x5c   :  { %v1460_v15 = vld [vmem:[#allocation4 + $0x240] ss:$28 sps:$4 sm:$0xff]  }
  0x5e   :  { %1003 = vmatpush2.bf16.msra.mxu0 %v1359_v63  ;;  %976 = vmatpush2.bf16.msra.mxu1 %v1404_v18  ;;  %v1439_v63 = vld [vmem:[#allocation4 + $0x50] ss:$28 sps:$4 sm:$0xff]  }
  0x5f   :  { %1004 = vmatprep.subr.bf16.mxu0 %v1367_v1  ;;  %1027 = vmatprep.subr.bf16.mxu1 %v1407_v19  ;;  %v1443_v1 = vld [vmem:[#allocation4 + $0x1d8] ss:$28 sps:$4 sm:$0xff]   ;;  %v1466_v19 = vld [vmem:[#allocation4 + $0x1d0] ss:$28 sps:$4 sm:$0xff]  }
  0x60   :  { %v1468_v18 = vld [vmem:[#allocation4 + $0x1d4] ss:$28 sps:$4 sm:$0xff]  }
  0x62   :  { %1005 = vmatpush2.bf16.msra.mxu0 %v1365_v2  ;;  %v1440_v2 = vld [vmem:[#allocation4 + $0x10] ss:$28 sps:$4 sm:$0xff]  }
  0x63   :  { %1006 = vmatprep.subr.bf16.mxu0 %v1373_v3  ;;  %v1444_v3 = vld [vmem:[#allocation4 + $0x18] ss:$28 sps:$4 sm:$0xff]  }
  0x66   :  { %1007 = vmatpush2.bf16.msra.mxu0 %v1371_v4  ;;  %v1447_v4 = vld [vmem:[#allocation4 + $0x35c] ss:$28 sps:$4 sm:$0xff]  }
  0x67   :  { %1008 = vmatprep.subr.bf16.mxu0 %v1379_v5  ;;  %v1445_v5 = vld [vmem:[#allocation4 + $0x358] ss:$28 sps:$4 sm:$0xff]  }
  0x6a   :  { %1009 = vmatpush2.bf16.msra.mxu0 %v1377_v6  ;;  %v1450_v6 = vld [vmem:[#allocation4 + $0x324] ss:$28 sps:$4 sm:$0xff]  }
  0x6b   :  { %1010 = vmatprep.subr.bf16.mxu0 %v1385_v7  ;;  %v1448_v7 = vld [vmem:[#allocation4 + $0x320] ss:$28 sps:$4 sm:$0xff]  }
  0x6e   :  { %1011 = vmatpush2.bf16.msra.mxu0 %v1383_v8  ;;  %v1453_v8 = vld [vmem:[#allocation4 + $0x2ec] ss:$28 sps:$4 sm:$0xff]  }
  0x6f   :  { %1012 = vmatprep.subr.bf16.mxu0 %v1391_v9  ;;  %v1451_v9 = vld [vmem:[#allocation4 + $0x2e8] ss:$28 sps:$4 sm:$0xff]  }
  0x72   :  { %1013 = vmatpush2.bf16.msra.mxu0 %v1389_v10  ;;  %v1456_v10 = vld [vmem:[#allocation4 + $0x2b4] ss:$28 sps:$4 sm:$0xff]  }
  0x73   :  { %1014 = vmatprep.subr.bf16.mxu0 %v1397_v12  ;;  %v1459_v12 = vld [vmem:[#allocation4 + $0x27c] ss:$28 sps:$4 sm:$0xff]  }
  0x76   :  { %1015 = vmatpush2.bf16.msra.mxu0 %v1395_v13  ;;  %v1457_v13 = vld [vmem:[#allocation4 + $0x278] ss:$28 sps:$4 sm:$0xff]  }
  0x77   :  { %1016 = vmatprep.subr.bf16.mxu0 %v1403_v16  ;;  %v1465_v16 = vld [vmem:[#allocation4 + $0x20c] ss:$28 sps:$4 sm:$0xff]  }
  0x7a   :  { %1017 = vmatpush2.bf16.msra.mxu0 %v1401_v17  ;;  %v1463_v17 = vld [vmem:[#allocation4 + $0x208] ss:$28 sps:$4 sm:$0xff]  }
  0x7b   :  { %1256 = vmatprep.subr.bf16.mxu0 %v1408_v20  ;;  %v344_v20 = vsub.s32 2, %v1573_v22 }
  0xfd   :  { %v193_v28 = vpop.f32.mrf.mxu0 }
  0xfe   :  { %v194_v29 = vadd.f32 %v193_v28, %v72_v26  ;;  %v337_v26 = vrot.slane %v332_v21, %v71_v23  ;;  %v341_v28 = vrot.slane %v332_v21, %v75_v25 }
  0xff   :  { %v195_v30 = vpop.f32.mrf.mxu0 }
 0x100   :  { %v196_v31 = vadd.f32 %v195_v30, %v76_v27  ;;  %v200_v32 = vmax.f32 %v194_v29, 0.0  ;;  %v345_v27 = vrot.slane %v332_v21, %v344_v20  ;;  %v349_v29 = vrot.slane %v332_v21, %v348_v24 }
 0x101   :  { %v197_v33 = vpop.f32.mrf.mxu0 }
 0x102   :  { %v201_v34 = vmax.f32 %v196_v31, 0.0  ;;  %v1584_v39 = vpack.c.bf16 %v200_v32, %v200_v32 }
 0x103   :  { %v198_v35 = vpop.f32.mrf.mxu0 }
 0x104   :  { %v203_v36 = vpack.c.bf16 %v201_v34, %v201_v34 }
 0x106   :  { %977 = vmatprep.mubr.bf16.mxu1 %v203_v36  ;;  %1018 = vmatprep.mubr.bf16.mxu0 %v203_v36 }
 0x107   :  { %978 = vmatmul.mubr.bf16.vlgmr.msra.gmra.mxu1 %v1584_v39  ;;  %1019 = vmatmul.mubr.bf16.vlgmr.msra.gmra.mxu0 %v1584_v39 }
 0x108   :  { %1028 = vmatpush1.bf16.msra.mxu1 %v1405_v37  ;;  %1257 = vmatpush3.bf16.msra.mxu0 %v1409_v38 }
 0x109   :  { %1059 = vmatprep.mubr.bf16.mxu1 %v203_v36  ;;  %1100 = vmatprep.mubr.bf16.mxu0 %v203_v36 }
 0x10a   :  { %1029 = vmatprep.subr.bf16.mxu1 %v1412_v40  ;;  %1258 = vmatprep.subr.bf16.mxu0 %v1413_v41 }
 0x10c   :  { %1030 = vmatpush1.bf16.msra.mxu1 %v1410_v42  ;;  %1259 = vmatpush3.bf16.msra.mxu0 %v1414_v43 }
 0x10d   :  { %1031 = vmatprep.subr.bf16.mxu1 %v1417_v44  ;;  %1260 = vmatprep.subr.bf16.mxu0 %v1418_v45  ;;  %v360_v44 = vsub.s32 6, %v1573_v22 }
 0x110   :  { %1032 = vmatpush1.bf16.msra.mxu1 %v1415_v46  ;;  %1261 = vmatpush3.bf16.msra.mxu0 %v1419_v47  ;;  %v361_v46 = vrot.slane %v332_v21, %v360_v44 }
 0x111   :  { %1033 = vmatprep.subr.bf16.mxu1 %v1422_v48  ;;  %1262 = vmatprep.subr.bf16.mxu0 %v1423_v49 }
 0x114   :  { %1034 = vmatpush1.bf16.msra.mxu1 %v1420_v50  ;;  %1263 = vmatpush3.bf16.msra.mxu0 %v1424_v51 }
 0x115   :  { %1035 = vmatprep.subr.bf16.mxu1 %v1427_v52  ;;  %1264 = vmatprep.subr.bf16.mxu0 %v1428_v53  ;;  %v352_v53 = vsub.s32 4, %v1573_v22 }
 0x118   :  { %1036 = vmatpush1.bf16.msra.mxu1 %v1425_v54  ;;  %1265 = vmatpush3.bf16.msra.mxu0 %v1429_v55  ;;  %v356_v54 = vsub.s32 5, %v1573_v22  ;;  %v353_v55 = vrot.slane %v332_v21, %v352_v53 }
 0x119   :  { %1037 = vmatprep.subr.bf16.mxu1 %v1432_v56  ;;  %1266 = vmatprep.subr.bf16.mxu0 %v1433_v57 }
 0x11a   :  { %v357_v56 = vrot.slane %v332_v21, %v356_v54 }
 0x11c   :  { %1038 = vmatpush1.bf16.msra.mxu1 %v1430_v58  ;;  %1267 = vmatpush3.bf16.msra.mxu0 %v1434_v59 }
 0x11d   :  { %1039 = vmatprep.subr.bf16.mxu1 %v1437_v60  ;;  %1268 = vmatprep.subr.bf16.mxu0 %v1438_v61 }
 0x120   :  { %1040 = vmatpush1.bf16.msra.mxu1 %v1435_v62  ;;  %1269 = vmatpush3.bf16.msra.mxu0 %v1439_v63 }
 0x121   :  { %1041 = vmatprep.subr.bf16.mxu1 %v1442_v0  ;;  %1270 = vmatprep.subr.bf16.mxu0 %v1443_v1 }
 0x124   :  { %1042 = vmatpush1.bf16.msra.mxu1 %v1440_v2  ;;  %1271 = vmatpush3.bf16.msra.mxu0 %v1444_v3 }
 0x125   :  { %1043 = vmatprep.subr.bf16.mxu1 %v1447_v4 }
 0x127   :  { %1101 = vmatmul.mubr.bf16.vlgmr.msra.gmra.mxu0 %v1584_v39 }
 0x128   :  { %1044 = vmatpush2.bf16.msra.mxu1 %v1445_v5 }
 0x129   :  { %1045 = vmatprep.subr.bf16.mxu1 %v1450_v6 }
 0x12c   :  { %1046 = vmatpush2.bf16.msra.mxu1 %v1448_v7 }
 0x12d   :  { %1047 = vmatprep.subr.bf16.mxu1 %v1453_v8 }
 0x130   :  { %1048 = vmatpush2.bf16.msra.mxu1 %v1451_v9 }
 0x131   :  { %1049 = vmatprep.subr.bf16.mxu1 %v1456_v10 }
 0x134   :  { %1050 = vmatpush2.bf16.msra.mxu1 %v1454_v11 }
 0x135   :  { %1051 = vmatprep.subr.bf16.mxu1 %v1459_v12 }
 0x138   :  { %1052 = vmatpush2.bf16.msra.mxu1 %v1457_v13 }
 0x139   :  { %1053 = vmatprep.subr.bf16.mxu1 %v1462_v14 }
 0x13c   :  { %1054 = vmatpush2.bf16.msra.mxu1 %v1460_v15 }
 0x13d   :  { %1055 = vmatprep.subr.bf16.mxu1 %v1465_v16 }
 0x140   :  { %1056 = vmatpush2.bf16.msra.mxu1 %v1463_v17 }
 0x141   :  { %1057 = vmatprep.subr.bf16.mxu1 %v1468_v18 }
 0x144   :  { %1058 = vmatpush2.bf16.msra.mxu1 %v1466_v19 }
 0x147   :  { %1060 = vmatmul.mubr.bf16.vlgmr.msra.gmra.mxu1 %v1584_v39 }
 0x1c7   :  { %v979_v30 = vpop.f32.mrf.mxu1  ;;  %v1020_v31 = vpop.f32.mrf.mxu0 }
 0x1c8   :  { %v980_v32 = vadd.f32 %v979_v30, %v337_v26  ;;  %v1021_v33 = vadd.f32 %v1020_v31, %v345_v27 }
 0x1c9   :  { %v981_v34 = vpop.f32.mrf.mxu1  ;;  %v1022_v35 = vpop.f32.mrf.mxu0 }
 0x1ca   :  { %1469 = vtanh.f32 %v980_v32  ;;  %v982_v36 = vadd.f32 %v981_v34, %v341_v28  ;;  %v1023_v37 = vadd.f32 %v1022_v35, %v349_v29 }
 0x1cb   :  { %1471 = vtanh.f32 %v1021_v33  ;;  %v983_v38 = vpop.f32.mrf.mxu1  ;;  %v1024_v39 = vpop.f32.mrf.mxu0 }
 0x1cc   :  { %1473 = vtanh.f32 %v982_v36 }
 0x1cd   :  { %1475 = vtanh.f32 %v1023_v37  ;;  %v984_v23 = vpop.f32.mrf.mxu1  ;;  %v1025_v40 = vpop.f32.mrf.mxu0 }
 0x1d7   :  { %v1470_v41 = vpop.eup %1469 }
 0x1d8   :  { %v1472_v42 = vpop.eup %1471  ;;  %1115 = vst [vmem:[%s1628_s5] sm:$0xff] %v1470_v41 }
 0x1d9   :  { %v1474_v25 = vpop.eup %1473  ;;  %1117 = vst [vmem:[%s1628_s5 + $0x10] sm:$0xff] %v1472_v42 }
 0x1da   :  { %v1476_v43 = vpop.eup %1475  ;;  %1116 = vst [vmem:[%s1628_s5 + $0x8] sm:$0xff] %v1474_v25 }
 0x1db   :  { %1118 = vst [vmem:[%s1628_s5 + $0x18] sm:$0xff] %v1476_v43 }
 0x1e7   :  { %v1272_v45 = vpop.f32.mrf.mxu0 }
 0x1e9   :  { %v1273_v47 = vpop.f32.mrf.mxu0 }
 0x1ea   :  { %v1274_v48 = vadd.f32 %v1273_v47, %v1272_v45 }
 0x1eb   :  { %v1275_v49 = vpop.f32.mrf.mxu0 }
 0x1ec   :  { %v1103_v50 = vadd.f32 %v1274_v48, %v361_v46 }
 0x1ed   :  { %v1276_v51 = vpop.f32.mrf.mxu0 }
 0x1ee   :  { %1477 = vtanh.f32 %v1103_v50 }
 0x1fb   :  { %v1478_v52 = vpop.eup %1477 }
 0x1fc   :  { %1121 = vst [vmem:[%s1628_s5 + $0x30] sm:$0xff] %v1478_v52 }
 0x207   :  { %v1061_v57 = vpop.f32.mrf.mxu1 }
 0x208   :  { %v1062_v58 = vadd.f32 %v1061_v57, %v353_v55 }
 0x209   :  { %v1063_v59 = vpop.f32.mrf.mxu1 }
 0x20a   :  { %1479 = vtanh.f32 %v1062_v58  ;;  %v1064_v60 = vadd.f32 %v1063_v59, %v357_v56 }
 0x20b   :  { %v1065_v61 = vpop.f32.mrf.mxu1 }
 0x20c   :  { %1481 = vtanh.f32 %v1064_v60 }
 0x20d   :  { %v1066_v62 = vpop.f32.mrf.mxu1 }
 0x217   :  { %v1480_v63 = vpop.eup %1479 }
 0x218   :  { %1119 = vst [vmem:[%s1628_s5 + $0x20] sm:$0xff] %v1480_v63 }
 0x219   :  { %v1482_v0 = vpop.eup %1481 }
 0x21a   :  { %1120 = vst [vmem:[%s1628_s5 + $0x28] sm:$0xff] %v1482_v0 }
 0x21b   :  { %1126 = vsyncpa [#allocation3], 1 }
 0x21c   :  { %1127 = vsyncpa [#allocation5], 1 }

</bundles_post_ra>
